<compile_context>
chip_gen: v6e
topology: v6e:2x2x1
jax: 0.10.0
libtpu: 0.0.40
codegen_flags: <defaults>
</compile_context>

<pallas_src>
import jax
import jax.numpy as jnp
from jax import lax
from jax.experimental import pallas as pl
from jax.experimental.pallas import tpu as pltpu


# ----------------------------------------------------------------------------
# Fused LSTM kernel: batched input projection + unrolled recurrence
# ----------------------------------------------------------------------------
def _crnn_lstm_kernel(x_ref, wih_ref, whh_ref, b_ref, out_ref):
    # x_ref:   (S*B, I)  time-major flattened LSTM input (row index = t*B + b)
    # wih_ref: (I, 4H)   input->gates weights (transposed vs. torch)
    # whh_ref: (H, 4H)   hidden->gates weights (transposed vs. torch)
    # b_ref:   (1, 4H)   combined bias (b_ih + b_hh)
    # out_ref: (B, S*H)  flattened hidden-state sequence (== nn.Flatten output)
    B = out_ref.shape[0]
    H = whh_ref.shape[0]
    S = x_ref.shape[0] // B

    # ---- Prologue: input projection for ALL timesteps as ONE MXU matmul ----
    # (off the serial critical path; bias broadcast/folded exactly once)
    xproj = (
        jnp.dot(x_ref[...], wih_ref[...], preferred_element_type=jnp.float32)
        + b_ref[...]
    )                                                     # (S*B, 4H)
    whh = whh_ref[...]                                    # (H, 4H), loaded once

    h = jnp.zeros((B, H), jnp.float32)
    c = jnp.zeros((B, H), jnp.float32)
    hs = []

    # ---- Recurrence: fully unrolled, one MXU dot per step, static slices ----
    for t in range(S):
        pre = xproj[t * B:(t + 1) * B, :] + jnp.dot(
            h, whh, preferred_element_type=jnp.float32)   # (B, 4H)
        # PyTorch gate order: i, f, g, o
        i_g = jax.nn.sigmoid(pre[:, 0:H])
        f_g = jax.nn.sigmoid(pre[:, H:2 * H])
        g_g = jnp.tanh(pre[:, 2 * H:3 * H])
        o_g = jax.nn.sigmoid(pre[:, 3 * H:4 * H])
        c = f_g * c + i_g * g_g
        h = o_g * jnp.tanh(c)
        hs.append(h)

    # ---- Epilogue: single lane-dense store of the whole (B, S*H) slab ----
    out_ref[...] = jnp.concatenate(hs, axis=-1)


def crnn_lstm_pallas(x_tm, w_ih_t, w_hh_t, bias, *, batch, hidden):
    sb, _ = x_tm.shape
    seq = sb // batch
    # All operands are a few KiB -> whole-array VMEM residency, no grid needed
    # at these shapes (add a batch/sequence grid only when scaling S*B up).
    return pl.pallas_call(
        _crnn_lstm_kernel,
        out_shape=jax.ShapeDtypeStruct((batch, seq * hidden), jnp.float32),
        in_specs=[pl.BlockSpec(memory_space=pltpu.MemorySpace.VMEM)] * 4,
        out_specs=pl.BlockSpec(memory_space=pltpu.MemorySpace.VMEM),
    )(x_tm, w_ih_t, w_hh_t, bias)


# ----------------------------------------------------------------------------
# Full forward (matches the PyTorch RNN module)
# ----------------------------------------------------------------------------
def rnn_forward(x, params):
    # x: (B, 1, T, F)
    w_ih, w_hh, b_ih, b_hh = params
    B = x.shape[0]
    out = jnp.squeeze(x, axis=1)             # (B, T, F)
    out = jnp.transpose(out, (0, 2, 1))      # (B, F, T)
    _, F, T = out.shape
    # MaxPool2d(2), floor mode (T, F even in this config) — trivial op, kept in
    # plain XLA; the heavy/serial part lives in the Pallas kernel.
    pooled = out.reshape(B, F // 2, 2, T // 2, 2).max(axis=(2, 4))  # (B, S, I)
    S, I = pooled.shape[1], pooled.shape[2]
    H = w_hh.shape[1]

    # Time-major rows (t*B + b) so the kernel can do one fused projection and
    # index each timestep contiguously with static slices.
    x_tm = jnp.transpose(pooled, (1, 0, 2)).reshape(S * B, I)
    bias = (b_ih + b_hh).reshape(1, -1).astype(jnp.float32)          # (1, 4H)
    w_ih_t = jnp.transpose(w_ih).astype(jnp.float32)                 # (I, 4H)
    w_hh_t = jnp.transpose(w_hh).astype(jnp.float32)                 # (H, 4H)
    return crnn_lstm_pallas(x_tm, w_ih_t, w_hh_t, bias, batch=B, hidden=H)


# ----------------------------------------------------------------------------
# Pure-JAX reference for verification
# ----------------------------------------------------------------------------
def rnn_reference(x, params):
    w_ih, w_hh, b_ih, b_hh = params
    out = jnp.squeeze(x, axis=1)
    out = jnp.transpose(out, (0, 2, 1))
    B, F, T = out.shape
    pooled = out.reshape(B, F // 2, 2, T // 2, 2).max(axis=(2, 4))
    H = w_hh.shape[1]

    def step(carry, x_t):
        h, c = carry
        pre = x_t @ w_ih.T + h @ w_hh.T + b_ih + b_hh
        i_g = jax.nn.sigmoid(pre[:, 0:H])
        f_g = jax.nn.sigmoid(pre[:, H:2 * H])
        g_g = jnp.tanh(pre[:, 2 * H:3 * H])
        o_g = jax.nn.sigmoid(pre[:, 3 * H:4 * H])
        c = f_g * c + i_g * g_g
        h = o_g * jnp.tanh(c)
        return (h, c), h

    h0 = jnp.zeros((B, H), jnp.float32)
    c0 = jnp.zeros((B, H), jnp.float32)
    xs = jnp.transpose(pooled, (1, 0, 2))
    _, hs = lax.scan(step, (h0, c0), xs)
    return jnp.transpose(hs, (1, 0, 2)).reshape(B, -1)


if __name__ == "__main__":
    # Module config: input_size = T = 16, hidden_size = 32 (small test shapes).
    B, T, F, H = 2, 16, 16, 32
    I = T // 2  # LSTM input feature size after the 2x2 max-pool

    key = jax.random.PRNGKey(0)
    kx, k1, k2, k3, k4 = jax.random.split(key, 5)
    x = jax.random.normal(kx, (B, 1, T, F), dtype=jnp.float32)

    # Deterministic PyTorch-style LSTM init: U(-1/sqrt(H), 1/sqrt(H))
    k = 1.0 / jnp.sqrt(jnp.float32(H))
    w_ih = jax.random.uniform(k1, (4 * H, I), jnp.float32, -k, k)
    w_hh = jax.random.uniform(k2, (4 * H, H), jnp.float32, -k, k)
    b_ih = jax.random.uniform(k3, (4 * H,), jnp.float32, -k, k)
    b_hh = jax.random.uniform(k4, (4 * H,), jnp.float32, -k, k)
    params = (w_ih, w_hh, b_ih, b_hh)

    out = jax.jit(rnn_forward)(x, params)
    out = jax.block_until_ready(out)

    ref = rnn_reference(x, params)
    assert out.shape == (B, (F // 2) * H), out.shape
    assert jnp.allclose(out, ref, atol=2e-5, rtol=2e-5), "mismatch vs reference"

    print("KERNEL_OK")
</pallas_src>

<mosaic_0001>
module attributes {stable_mosaic.version = 11 : i64} {
  func.func @_crnn_lstm_kernel(%arg0: memref<16x8xf32, #tpu.memory_space<vmem>>, %arg1: memref<8x128xf32, #tpu.memory_space<vmem>>, %arg2: memref<32x128xf32, #tpu.memory_space<vmem>>, %arg3: memref<1x128xf32, #tpu.memory_space<vmem>>, %arg4: memref<2x256xf32, #tpu.memory_space<vmem>>) attributes {dimension_semantics = [], scalar_prefetch = 0 : i64, scratch_operands = 0 : i64, tpu.core_type = #tpu.core_type<tc>} {
    %c0 = arith.constant 0 : index
    %c0_0 = arith.constant 0 : index
    %0 = vector.load %arg0[%c0, %c0_0] : memref<16x8xf32, #tpu.memory_space<vmem>>, vector<16x8xf32>
    %c0_1 = arith.constant 0 : index
    %c0_2 = arith.constant 0 : index
    %1 = vector.load %arg1[%c0_1, %c0_2] : memref<8x128xf32, #tpu.memory_space<vmem>>, vector<8x128xf32>
    %cst = arith.constant dense<0.000000e+00> : vector<16x128xf32>
    %2 = tpu.matmul %0, %1, %cst {dimension_numbers = #tpu.dot_dimension_numbers<[1], [0], [0], [1], [0, 0, 1, 1], [], []>} : vector<16x8xf32>, vector<8x128xf32>, vector<16x128xf32> -> vector<16x128xf32>
    %c0_3 = arith.constant 0 : index
    %c0_4 = arith.constant 0 : index
    %3 = vector.load %arg3[%c0_3, %c0_4] : memref<1x128xf32, #tpu.memory_space<vmem>>, vector<1x128xf32>
    %4 = vector.broadcast %3 : vector<1x128xf32> to vector<16x128xf32>
    %5 = arith.addf %2, %4 : vector<16x128xf32>
    %c0_5 = arith.constant 0 : index
    %c0_6 = arith.constant 0 : index
    %6 = vector.load %arg2[%c0_5, %c0_6] : memref<32x128xf32, #tpu.memory_space<vmem>>, vector<32x128xf32>
    %cst_7 = arith.constant 0.000000e+00 : f32
    %7 = vector.broadcast %cst_7 : f32 to vector<2x32xf32>
    %cst_8 = arith.constant 0.000000e+00 : f32
    %8 = vector.broadcast %cst_8 : f32 to vector<2x32xf32>
    %9 = vector.extract_strided_slice %5 {offsets = [0, 0], sizes = [2, 128], strides = [1, 1]} : vector<16x128xf32> to vector<2x128xf32>
    %cst_9 = arith.constant dense<0.000000e+00> : vector<2x128xf32>
    %10 = tpu.matmul %7, %6, %cst_9 {dimension_numbers = #tpu.dot_dimension_numbers<[1], [0], [0], [1], [0, 0, 1, 1], [], []>} : vector<2x32xf32>, vector<32x128xf32>, vector<2x128xf32> -> vector<2x128xf32>
    %11 = arith.addf %9, %10 : vector<2x128xf32>
    %12 = vector.extract_strided_slice %11 {offsets = [0, 0], sizes = [2, 32], strides = [1, 1]} : vector<2x128xf32> to vector<2x32xf32>
    %13 = arith.negf %12 : vector<2x32xf32>
    %14 = math.exp %13 : vector<2x32xf32>
    %cst_10 = arith.constant 1.000000e+00 : f32
    %15 = vector.broadcast %cst_10 : f32 to vector<2x32xf32>
    %16 = arith.addf %15, %14 : vector<2x32xf32>
    %17 = arith.divf %15, %16 : vector<2x32xf32>
    %18 = vector.extract_strided_slice %11 {offsets = [0, 32], sizes = [2, 32], strides = [1, 1]} : vector<2x128xf32> to vector<2x32xf32>
    %19 = arith.negf %18 : vector<2x32xf32>
    %20 = math.exp %19 : vector<2x32xf32>
    %cst_11 = arith.constant 1.000000e+00 : f32
    %21 = vector.broadcast %cst_11 : f32 to vector<2x32xf32>
    %22 = arith.addf %21, %20 : vector<2x32xf32>
    %23 = arith.divf %21, %22 : vector<2x32xf32>
    %24 = vector.extract_strided_slice %11 {offsets = [0, 64], sizes = [2, 32], strides = [1, 1]} : vector<2x128xf32> to vector<2x32xf32>
    %25 = math.tanh %24 : vector<2x32xf32>
    %26 = vector.extract_strided_slice %11 {offsets = [0, 96], sizes = [2, 32], strides = [1, 1]} : vector<2x128xf32> to vector<2x32xf32>
    %27 = arith.negf %26 : vector<2x32xf32>
    %28 = math.exp %27 : vector<2x32xf32>
    %cst_12 = arith.constant 1.000000e+00 : f32
    %29 = vector.broadcast %cst_12 : f32 to vector<2x32xf32>
    %30 = arith.addf %29, %28 : vector<2x32xf32>
    %31 = arith.divf %29, %30 : vector<2x32xf32>
    %32 = arith.mulf %23, %8 : vector<2x32xf32>
    %33 = arith.mulf %17, %25 : vector<2x32xf32>
    %34 = arith.addf %32, %33 : vector<2x32xf32>
    %35 = math.tanh %34 : vector<2x32xf32>
    %36 = arith.mulf %31, %35 : vector<2x32xf32>
    %37 = vector.extract_strided_slice %5 {offsets = [2, 0], sizes = [2, 128], strides = [1, 1]} : vector<16x128xf32> to vector<2x128xf32>
    %cst_13 = arith.constant dense<0.000000e+00> : vector<2x128xf32>
    %38 = tpu.matmul %36, %6, %cst_13 {dimension_numbers = #tpu.dot_dimension_numbers<[1], [0], [0], [1], [0, 0, 1, 1], [], []>} : vector<2x32xf32>, vector<32x128xf32>, vector<2x128xf32> -> vector<2x128xf32>
    %39 = arith.addf %37, %38 : vector<2x128xf32>
    %40 = vector.extract_strided_slice %39 {offsets = [0, 0], sizes = [2, 32], strides = [1, 1]} : vector<2x128xf32> to vector<2x32xf32>
    %41 = arith.negf %40 : vector<2x32xf32>
    %42 = math.exp %41 : vector<2x32xf32>
    %cst_14 = arith.constant 1.000000e+00 : f32
    %43 = vector.broadcast %cst_14 : f32 to vector<2x32xf32>
    %44 = arith.addf %43, %42 : vector<2x32xf32>
    %45 = arith.divf %43, %44 : vector<2x32xf32>
    %46 = vector.extract_strided_slice %39 {offsets = [0, 32], sizes = [2, 32], strides = [1, 1]} : vector<2x128xf32> to vector<2x32xf32>
    %47 = arith.negf %46 : vector<2x32xf32>
    %48 = math.exp %47 : vector<2x32xf32>
    %cst_15 = arith.constant 1.000000e+00 : f32
    %49 = vector.broadcast %cst_15 : f32 to vector<2x32xf32>
    %50 = arith.addf %49, %48 : vector<2x32xf32>
    %51 = arith.divf %49, %50 : vector<2x32xf32>
    %52 = vector.extract_strided_slice %39 {offsets = [0, 64], sizes = [2, 32], strides = [1, 1]} : vector<2x128xf32> to vector<2x32xf32>
    %53 = math.tanh %52 : vector<2x32xf32>
    %54 = vector.extract_strided_slice %39 {offsets = [0, 96], sizes = [2, 32], strides = [1, 1]} : vector<2x128xf32> to vector<2x32xf32>
    %55 = arith.negf %54 : vector<2x32xf32>
    %56 = math.exp %55 : vector<2x32xf32>
    %cst_16 = arith.constant 1.000000e+00 : f32
    %57 = vector.broadcast %cst_16 : f32 to vector<2x32xf32>
    %58 = arith.addf %57, %56 : vector<2x32xf32>
    %59 = arith.divf %57, %58 : vector<2x32xf32>
    %60 = arith.mulf %51, %34 : vector<2x32xf32>
    %61 = arith.mulf %45, %53 : vector<2x32xf32>
    %62 = arith.addf %60, %61 : vector<2x32xf32>
    %63 = math.tanh %62 : vector<2x32xf32>
    %64 = arith.mulf %59, %63 : vector<2x32xf32>
    %65 = vector.extract_strided_slice %5 {offsets = [4, 0], sizes = [2, 128], strides = [1, 1]} : vector<16x128xf32> to vector<2x128xf32>
    %cst_17 = arith.constant dense<0.000000e+00> : vector<2x128xf32>
    %66 = tpu.matmul %64, %6, %cst_17 {dimension_numbers = #tpu.dot_dimension_numbers<[1], [0], [0], [1], [0, 0, 1, 1], [], []>} : vector<2x32xf32>, vector<32x128xf32>, vector<2x128xf32> -> vector<2x128xf32>
    %67 = arith.addf %65, %66 : vector<2x128xf32>
    %68 = vector.extract_strided_slice %67 {offsets = [0, 0], sizes = [2, 32], strides = [1, 1]} : vector<2x128xf32> to vector<2x32xf32>
    %69 = arith.negf %68 : vector<2x32xf32>
    %70 = math.exp %69 : vector<2x32xf32>
    %cst_18 = arith.constant 1.000000e+00 : f32
    %71 = vector.broadcast %cst_18 : f32 to vector<2x32xf32>
    %72 = arith.addf %71, %70 : vector<2x32xf32>
    %73 = arith.divf %71, %72 : vector<2x32xf32>
    %74 = vector.extract_strided_slice %67 {offsets = [0, 32], sizes = [2, 32], strides = [1, 1]} : vector<2x128xf32> to vector<2x32xf32>
    %75 = arith.negf %74 : vector<2x32xf32>
    %76 = math.exp %75 : vector<2x32xf32>
    %cst_19 = arith.constant 1.000000e+00 : f32
    %77 = vector.broadcast %cst_19 : f32 to vector<2x32xf32>
    %78 = arith.addf %77, %76 : vector<2x32xf32>
    %79 = arith.divf %77, %78 : vector<2x32xf32>
    %80 = vector.extract_strided_slice %67 {offsets = [0, 64], sizes = [2, 32], strides = [1, 1]} : vector<2x128xf32> to vector<2x32xf32>
    %81 = math.tanh %80 : vector<2x32xf32>
    %82 = vector.extract_strided_slice %67 {offsets = [0, 96], sizes = [2, 32], strides = [1, 1]} : vector<2x128xf32> to vector<2x32xf32>
    %83 = arith.negf %82 : vector<2x32xf32>
    %84 = math.exp %83 : vector<2x32xf32>
    %cst_20 = arith.constant 1.000000e+00 : f32
    %85 = vector.broadcast %cst_20 : f32 to vector<2x32xf32>
    %86 = arith.addf %85, %84 : vector<2x32xf32>
    %87 = arith.divf %85, %86 : vector<2x32xf32>
    %88 = arith.mulf %79, %62 : vector<2x32xf32>
    %89 = arith.mulf %73, %81 : vector<2x32xf32>
    %90 = arith.addf %88, %89 : vector<2x32xf32>
    %91 = math.tanh %90 : vector<2x32xf32>
    %92 = arith.mulf %87, %91 : vector<2x32xf32>
    %93 = vector.extract_strided_slice %5 {offsets = [6, 0], sizes = [2, 128], strides = [1, 1]} : vector<16x128xf32> to vector<2x128xf32>
    %cst_21 = arith.constant dense<0.000000e+00> : vector<2x128xf32>
    %94 = tpu.matmul %92, %6, %cst_21 {dimension_numbers = #tpu.dot_dimension_numbers<[1], [0], [0], [1], [0, 0, 1, 1], [], []>} : vector<2x32xf32>, vector<32x128xf32>, vector<2x128xf32> -> vector<2x128xf32>
    %95 = arith.addf %93, %94 : vector<2x128xf32>
    %96 = vector.extract_strided_slice %95 {offsets = [0, 0], sizes = [2, 32], strides = [1, 1]} : vector<2x128xf32> to vector<2x32xf32>
    %97 = arith.negf %96 : vector<2x32xf32>
    %98 = math.exp %97 : vector<2x32xf32>
    %cst_22 = arith.constant 1.000000e+00 : f32
    %99 = vector.broadcast %cst_22 : f32 to vector<2x32xf32>
    %100 = arith.addf %99, %98 : vector<2x32xf32>
    %101 = arith.divf %99, %100 : vector<2x32xf32>
    %102 = vector.extract_strided_slice %95 {offsets = [0, 32], sizes = [2, 32], strides = [1, 1]} : vector<2x128xf32> to vector<2x32xf32>
    %103 = arith.negf %102 : vector<2x32xf32>
    %104 = math.exp %103 : vector<2x32xf32>
    %cst_23 = arith.constant 1.000000e+00 : f32
    %105 = vector.broadcast %cst_23 : f32 to vector<2x32xf32>
    %106 = arith.addf %105, %104 : vector<2x32xf32>
    %107 = arith.divf %105, %106 : vector<2x32xf32>
    %108 = vector.extract_strided_slice %95 {offsets = [0, 64], sizes = [2, 32], strides = [1, 1]} : vector<2x128xf32> to vector<2x32xf32>
    %109 = math.tanh %108 : vector<2x32xf32>
    %110 = vector.extract_strided_slice %95 {offsets = [0, 96], sizes = [2, 32], strides = [1, 1]} : vector<2x128xf32> to vector<2x32xf32>
    %111 = arith.negf %110 : vector<2x32xf32>
    %112 = math.exp %111 : vector<2x32xf32>
    %cst_24 = arith.constant 1.000000e+00 : f32
    %113 = vector.broadcast %cst_24 : f32 to vector<2x32xf32>
    %114 = arith.addf %113, %112 : vector<2x32xf32>
    %115 = arith.divf %113, %114 : vector<2x32xf32>
    %116 = arith.mulf %107, %90 : vector<2x32xf32>
    %117 = arith.mulf %101, %109 : vector<2x32xf32>
    %118 = arith.addf %116, %117 : vector<2x32xf32>
    %119 = math.tanh %118 : vector<2x32xf32>
    %120 = arith.mulf %115, %119 : vector<2x32xf32>
    %121 = vector.extract_strided_slice %5 {offsets = [8, 0], sizes = [2, 128], strides = [1, 1]} : vector<16x128xf32> to vector<2x128xf32>
    %cst_25 = arith.constant dense<0.000000e+00> : vector<2x128xf32>
    %122 = tpu.matmul %120, %6, %cst_25 {dimension_numbers = #tpu.dot_dimension_numbers<[1], [0], [0], [1], [0, 0, 1, 1], [], []>} : vector<2x32xf32>, vector<32x128xf32>, vector<2x128xf32> -> vector<2x128xf32>
    %123 = arith.addf %121, %122 : vector<2x128xf32>
    %124 = vector.extract_strided_slice %123 {offsets = [0, 0], sizes = [2, 32], strides = [1, 1]} : vector<2x128xf32> to vector<2x32xf32>
    %125 = arith.negf %124 : vector<2x32xf32>
    %126 = math.exp %125 : vector<2x32xf32>
    %cst_26 = arith.constant 1.000000e+00 : f32
    %127 = vector.broadcast %cst_26 : f32 to vector<2x32xf32>
    %128 = arith.addf %127, %126 : vector<2x32xf32>
    %129 = arith.divf %127, %128 : vector<2x32xf32>
    %130 = vector.extract_strided_slice %123 {offsets = [0, 32], sizes = [2, 32], strides = [1, 1]} : vector<2x128xf32> to vector<2x32xf32>
    %131 = arith.negf %130 : vector<2x32xf32>
    %132 = math.exp %131 : vector<2x32xf32>
    %cst_27 = arith.constant 1.000000e+00 : f32
    %133 = vector.broadcast %cst_27 : f32 to vector<2x32xf32>
    %134 = arith.addf %133, %132 : vector<2x32xf32>
    %135 = arith.divf %133, %134 : vector<2x32xf32>
    %136 = vector.extract_strided_slice %123 {offsets = [0, 64], sizes = [2, 32], strides = [1, 1]} : vector<2x128xf32> to vector<2x32xf32>
    %137 = math.tanh %136 : vector<2x32xf32>
    %138 = vector.extract_strided_slice %123 {offsets = [0, 96], sizes = [2, 32], strides = [1, 1]} : vector<2x128xf32> to vector<2x32xf32>
    %139 = arith.negf %138 : vector<2x32xf32>
    %140 = math.exp %139 : vector<2x32xf32>
    %cst_28 = arith.constant 1.000000e+00 : f32
    %141 = vector.broadcast %cst_28 : f32 to vector<2x32xf32>
    %142 = arith.addf %141, %140 : vector<2x32xf32>
    %143 = arith.divf %141, %142 : vector<2x32xf32>
    %144 = arith.mulf %135, %118 : vector<2x32xf32>
    %145 = arith.mulf %129, %137 : vector<2x32xf32>
    %146 = arith.addf %144, %145 : vector<2x32xf32>
    %147 = math.tanh %146 : vector<2x32xf32>
    %148 = arith.mulf %143, %147 : vector<2x32xf32>
    %149 = vector.extract_strided_slice %5 {offsets = [10, 0], sizes = [2, 128], strides = [1, 1]} : vector<16x128xf32> to vector<2x128xf32>
    %cst_29 = arith.constant dense<0.000000e+00> : vector<2x128xf32>
    %150 = tpu.matmul %148, %6, %cst_29 {dimension_numbers = #tpu.dot_dimension_numbers<[1], [0], [0], [1], [0, 0, 1, 1], [], []>} : vector<2x32xf32>, vector<32x128xf32>, vector<2x128xf32> -> vector<2x128xf32>
    %151 = arith.addf %149, %150 : vector<2x128xf32>
    %152 = vector.extract_strided_slice %151 {offsets = [0, 0], sizes = [2, 32], strides = [1, 1]} : vector<2x128xf32> to vector<2x32xf32>
    %153 = arith.negf %152 : vector<2x32xf32>
    %154 = math.exp %153 : vector<2x32xf32>
    %cst_30 = arith.constant 1.000000e+00 : f32
    %155 = vector.broadcast %cst_30 : f32 to vector<2x32xf32>
    %156 = arith.addf %155, %154 : vector<2x32xf32>
    %157 = arith.divf %155, %156 : vector<2x32xf32>
    %158 = vector.extract_strided_slice %151 {offsets = [0, 32], sizes = [2, 32], strides = [1, 1]} : vector<2x128xf32> to vector<2x32xf32>
    %159 = arith.negf %158 : vector<2x32xf32>
    %160 = math.exp %159 : vector<2x32xf32>
    %cst_31 = arith.constant 1.000000e+00 : f32
    %161 = vector.broadcast %cst_31 : f32 to vector<2x32xf32>
    %162 = arith.addf %161, %160 : vector<2x32xf32>
    %163 = arith.divf %161, %162 : vector<2x32xf32>
    %164 = vector.extract_strided_slice %151 {offsets = [0, 64], sizes = [2, 32], strides = [1, 1]} : vector<2x128xf32> to vector<2x32xf32>
    %165 = math.tanh %164 : vector<2x32xf32>
    %166 = vector.extract_strided_slice %151 {offsets = [0, 96], sizes = [2, 32], strides = [1, 1]} : vector<2x128xf32> to vector<2x32xf32>
    %167 = arith.negf %166 : vector<2x32xf32>
    %168 = math.exp %167 : vector<2x32xf32>
    %cst_32 = arith.constant 1.000000e+00 : f32
    %169 = vector.broadcast %cst_32 : f32 to vector<2x32xf32>
    %170 = arith.addf %169, %168 : vector<2x32xf32>
    %171 = arith.divf %169, %170 : vector<2x32xf32>
    %172 = arith.mulf %163, %146 : vector<2x32xf32>
    %173 = arith.mulf %157, %165 : vector<2x32xf32>
    %174 = arith.addf %172, %173 : vector<2x32xf32>
    %175 = math.tanh %174 : vector<2x32xf32>
    %176 = arith.mulf %171, %175 : vector<2x32xf32>
    %177 = vector.extract_strided_slice %5 {offsets = [12, 0], sizes = [2, 128], strides = [1, 1]} : vector<16x128xf32> to vector<2x128xf32>
    %cst_33 = arith.constant dense<0.000000e+00> : vector<2x128xf32>
    %178 = tpu.matmul %176, %6, %cst_33 {dimension_numbers = #tpu.dot_dimension_numbers<[1], [0], [0], [1], [0, 0, 1, 1], [], []>} : vector<2x32xf32>, vector<32x128xf32>, vector<2x128xf32> -> vector<2x128xf32>
    %179 = arith.addf %177, %178 : vector<2x128xf32>
    %180 = vector.extract_strided_slice %179 {offsets = [0, 0], sizes = [2, 32], strides = [1, 1]} : vector<2x128xf32> to vector<2x32xf32>
    %181 = arith.negf %180 : vector<2x32xf32>
    %182 = math.exp %181 : vector<2x32xf32>
    %cst_34 = arith.constant 1.000000e+00 : f32
    %183 = vector.broadcast %cst_34 : f32 to vector<2x32xf32>
    %184 = arith.addf %183, %182 : vector<2x32xf32>
    %185 = arith.divf %183, %184 : vector<2x32xf32>
    %186 = vector.extract_strided_slice %179 {offsets = [0, 32], sizes = [2, 32], strides = [1, 1]} : vector<2x128xf32> to vector<2x32xf32>
    %187 = arith.negf %186 : vector<2x32xf32>
    %188 = math.exp %187 : vector<2x32xf32>
    %cst_35 = arith.constant 1.000000e+00 : f32
    %189 = vector.broadcast %cst_35 : f32 to vector<2x32xf32>
    %190 = arith.addf %189, %188 : vector<2x32xf32>
    %191 = arith.divf %189, %190 : vector<2x32xf32>
    %192 = vector.extract_strided_slice %179 {offsets = [0, 64], sizes = [2, 32], strides = [1, 1]} : vector<2x128xf32> to vector<2x32xf32>
    %193 = math.tanh %192 : vector<2x32xf32>
    %194 = vector.extract_strided_slice %179 {offsets = [0, 96], sizes = [2, 32], strides = [1, 1]} : vector<2x128xf32> to vector<2x32xf32>
    %195 = arith.negf %194 : vector<2x32xf32>
    %196 = math.exp %195 : vector<2x32xf32>
    %cst_36 = arith.constant 1.000000e+00 : f32
    %197 = vector.broadcast %cst_36 : f32 to vector<2x32xf32>
    %198 = arith.addf %197, %196 : vector<2x32xf32>
    %199 = arith.divf %197, %198 : vector<2x32xf32>
    %200 = arith.mulf %191, %174 : vector<2x32xf32>
    %201 = arith.mulf %185, %193 : vector<2x32xf32>
    %202 = arith.addf %200, %201 : vector<2x32xf32>
    %203 = math.tanh %202 : vector<2x32xf32>
    %204 = arith.mulf %199, %203 : vector<2x32xf32>
    %205 = vector.extract_strided_slice %5 {offsets = [14, 0], sizes = [2, 128], strides = [1, 1]} : vector<16x128xf32> to vector<2x128xf32>
    %cst_37 = arith.constant dense<0.000000e+00> : vector<2x128xf32>
    %206 = tpu.matmul %204, %6, %cst_37 {dimension_numbers = #tpu.dot_dimension_numbers<[1], [0], [0], [1], [0, 0, 1, 1], [], []>} : vector<2x32xf32>, vector<32x128xf32>, vector<2x128xf32> -> vector<2x128xf32>
    %207 = arith.addf %205, %206 : vector<2x128xf32>
    %208 = vector.extract_strided_slice %207 {offsets = [0, 0], sizes = [2, 32], strides = [1, 1]} : vector<2x128xf32> to vector<2x32xf32>
    %209 = arith.negf %208 : vector<2x32xf32>
    %210 = math.exp %209 : vector<2x32xf32>
    %cst_38 = arith.constant 1.000000e+00 : f32
    %211 = vector.broadcast %cst_38 : f32 to vector<2x32xf32>
    %212 = arith.addf %211, %210 : vector<2x32xf32>
    %213 = arith.divf %211, %212 : vector<2x32xf32>
    %214 = vector.extract_strided_slice %207 {offsets = [0, 32], sizes = [2, 32], strides = [1, 1]} : vector<2x128xf32> to vector<2x32xf32>
    %215 = arith.negf %214 : vector<2x32xf32>
    %216 = math.exp %215 : vector<2x32xf32>
    %cst_39 = arith.constant 1.000000e+00 : f32
    %217 = vector.broadcast %cst_39 : f32 to vector<2x32xf32>
    %218 = arith.addf %217, %216 : vector<2x32xf32>
    %219 = arith.divf %217, %218 : vector<2x32xf32>
    %220 = vector.extract_strided_slice %207 {offsets = [0, 64], sizes = [2, 32], strides = [1, 1]} : vector<2x128xf32> to vector<2x32xf32>
    %221 = math.tanh %220 : vector<2x32xf32>
    %222 = vector.extract_strided_slice %207 {offsets = [0, 96], sizes = [2, 32], strides = [1, 1]} : vector<2x128xf32> to vector<2x32xf32>
    %223 = arith.negf %222 : vector<2x32xf32>
    %224 = math.exp %223 : vector<2x32xf32>
    %cst_40 = arith.constant 1.000000e+00 : f32
    %225 = vector.broadcast %cst_40 : f32 to vector<2x32xf32>
    %226 = arith.addf %225, %224 : vector<2x32xf32>
    %227 = arith.divf %225, %226 : vector<2x32xf32>
    %228 = arith.mulf %219, %202 : vector<2x32xf32>
    %229 = arith.mulf %213, %221 : vector<2x32xf32>
    %230 = arith.addf %228, %229 : vector<2x32xf32>
    %231 = math.tanh %230 : vector<2x32xf32>
    %232 = arith.mulf %227, %231 : vector<2x32xf32>
    %233 = tpu.concatenate %36, %64, %92, %120, %148, %176, %204, %232 in 1 : vector<2x32xf32>, vector<2x32xf32>, vector<2x32xf32>, vector<2x32xf32>, vector<2x32xf32>, vector<2x32xf32>, vector<2x32xf32>, vector<2x32xf32> -> vector<2x256xf32>
    %c0_41 = arith.constant 0 : index
    %c0_42 = arith.constant 0 : index
    %234 = vector.load %arg4[%c0_41, %c0_42] : memref<2x256xf32, #tpu.memory_space<vmem>>, vector<2x256xf32>
    tpu.vector_store %arg4[%c0_41, %c0_42], %233 {strides = array<i32>} : memref<2x256xf32, #tpu.memory_space<vmem>>, vector<2x256xf32>,
    return
  }
}

</mosaic_0001>

<bundles_post_ra>
// kernel: rnn_forward.1
= control target key start
LH: loop header
LB: loop body
LE: loop exit
PB: predicated region body
PF: predicated region fallthrough
CT: control target
= control target key end

     0   :  { %vm28_vm0 = vcmask 64512   ;;  %v1256_v3 = vmov 0.0   ;;  %s1486_s0 = inlined_call_operand.vmem [shape: f32[16,8], index: 0, kind: input, shape index: {}]   ;;  %s1487_s1 = inlined_call_operand.vmem [shape: f32[8,128], index: 1, kind: input, shape index: {}]   ;;  %s1488_s2 = inlined_call_operand.vmem [shape: f32[32,128], index: 2, kind: input, shape index: {}]   ;;  %s1489_s3 = inlined_call_operand.vmem [shape: f32[1,128], index: 3, kind: input, shape index: {}]   ;;  %s1490_s4 = inlined_call_operand.hbm [shape: f32[2,256], index: 4, kind: output, shape index: {}]  }
   0x1   :  { %v20_v0 = vld [vmem:[%s1487_s1] sm:$0xff]  ;;  %v1296_v2 = vld [vmem:[%s1488_s2 + $0x18] sm:$0xff]  ;;  %1076 = vmatprep.subr.mxu1 %v1256_v3  ;;  %v19_v4 = vld [vmem:[%s1486_s0 + $0x8] sm:$0xff] }
   0x2   :  { %v18_v1 = vld [vmem:[%s1486_s0] sm:$0xff]  ;;  %1071 = vmatprep.subr.mxu0 %v20_v0  ;;  %v1305_v5 = vld [vmem:[%s1488_s2 + $0x10] sm:$0xff] }
   0x3   :  { %1072 = vmatpush3.msra.mxu0 %v20_v0  ;;  %1073 = vmatprep.mubr.msk.f32.mxu0 %vm28_vm0, %v18_v1 }
   0x4   :  { %9 = vsyncpa [#allocation3], 0  ;;  %1077 = vmatpush3.msra.mxu1 %v1296_v2  ;;  %1074 = vmatmul.mubr.msk.f32.vlgmr.msra.gmra.mxu0 %vm28_vm0, %v19_v4  ;;  %v1312_v6 = vld [vmem:[%s1488_s2 + $0x8] sm:$0xff]  ;;  %vm1257_vm1 = vmmov 0   ;;  %v1322_v7 = vld [vmem:[%s1488_s2] sm:$0xff]  ;;  %s1258_s28 = smov 64  }
   0x5   :  { %1078 = vmatprep.subr.mxu1 %v1256_v3  ;;  %1084 = vmatprep.mubr.msk.f32.mxu1 %vm1257_vm1, %v1256_v3  ;;  %v1009_v8 = vld [vmem:[%s1489_s3] ss:$0 sm:$0xff]  ;;  %s1259_s3 = smov 32   ;;  %vm114_vm2 = vcmask 261120   ;;  %s1260_s29 = smov 96   ;;  %vm976_vm3 = vcmask 523264  }
   0x6   :  { %1079 = vmatpush3.msra.mxu1 %v1305_v5  ;;  %1087 = vmatprep.subr.mxu0 %v1256_v3  ;;  %vm978_vm4 = vcmask 785408   ;;  %s1261_s30 = smov [#allocation2]  }
   0x7   :  { %1080 = vmatprep.subr.mxu1 %v1256_v3  ;;  %1088 = vmatpush3.msra.mxu0 %v1296_v2  ;;  %s1001_s5 = sshll.u32 %s1261_s30, 4  ;;  %s1002_s5 = int_to_ptr.vmem [resolvable:$true] %s1001_s5 }
   0x8   :  { %1081 = vmatpush3.msra.mxu1 %v1312_v6  ;;  %1089 = vmatprep.subr.mxu0 %v1256_v3  ;;  %s1234_s6 = scalar_lea.vmem %s1002_s5, 64  ;;  %p1239_p1 = scmp.lt.s32.totalorder %s1002_s5, %s1002_s5 }
   0x9   :  { %1082 = vmatprep.subr.mxu1 %v1256_v3  ;;  %1090 = vmatpush3.msra.mxu0 %v1305_v5  ;;  %p1235_p0 = scmp.ne.s32.totalorder %s1002_s5, %s1234_s6  ;;  %p1240_p2 = scmp.lt.s32.totalorder %s1234_s6, %s1234_s6 }
   0xa   :  { %1083 = vmatpush3.msra.mxu1 %v1322_v7  ;;  %1091 = vmatprep.subr.mxu0 %v1256_v3 }
   0xb   :  { %1085 = vmatmul.mubr.f32.vlgmr.msra.gmra.mxu1 %v1256_v3  ;;  %1092 = vmatpush3.msra.mxu0 %v1312_v6  ;;  %p1241_p3 = por %p1240_p2, %p1239_p1 }
   0xc   :  { %1093 = vmatprep.subr.mxu0 %v1256_v3  ;;  %1095 = vmatprep.mubr.msk.f32.mxu0 %vm1257_vm1, %v1256_v3 }
   0xd   :  { %1094 = vmatpush3.msra.mxu0 %v1322_v7  ;;  %1098 = vmatprep.subr.mxu1 %v1256_v3  ;;  %p1242_p4 = pnand %p1241_p3, %p1235_p0 }
   0xe   :  { %1099 = vmatpush3.msra.mxu1 %v1296_v2  ;;  %1106 = vmatprep.mubr.msk.f32.mxu1 %vm1257_vm1, %v1256_v3 }
   0xf   :  { %1100 = vmatprep.subr.mxu1 %v1256_v3  ;;  %1109 = vmatprep.subr.mxu0 %v1256_v3 }
  0x10   :  { %1101 = vmatpush3.msra.mxu1 %v1305_v5 }
  0x11   :  { %1102 = vmatprep.subr.mxu1 %v1256_v3 }
  0x12   :  { %1103 = vmatpush3.msra.mxu1 %v1312_v6 }
  0x13   :  { %1104 = vmatprep.subr.mxu1 %v1256_v3 }
  0x14   :  { %1105 = vmatpush3.msra.mxu1 %v1322_v7 }
  0x15   :  { %1120 = vmatprep.subr.mxu1 %v1256_v3 }
  0xc4   :  { %v1075_v9 = vpop.f32.mrf.mxu0 }
  0xc5   :  { %v1352_v10 = vadd.f32 %v1075_v9, %v1009_v8 }
  0xc6   :  { %v101_v11 = vpop.f32.mrf.mxu0 }
  0xc7   :  { %v1354_v12 = vadd.f32 %v1009_v8, %v101_v11 }
  0xcb   :  { %v184_v13 = vpop.f32.mrf.mxu1 }
  0xcc   :  { %v188_v14 = vadd.f32 %v184_v13, %v1354_v12 }
  0xcd   :  { %v1086_v15 = vpop.f32.mrf.mxu1 }
  0xce   :  { %1170 = vtanh.f32 %v188_v14  ;;  %v1012_v17 = vmul.f32 -1.442695, %v188_v14 }
  0xd0   :  { %1172 = vpow2.f32 %v1012_v17 }
  0xdb   :  { %v1171_v16 = vpop.eup %1170 }
  0xdc   :  { %198 = vrot.lane.b32.xlu0 %v1171_v16, %s1258_s28 }
  0xdd   :  { %v1173_v18 = vpop.eup %1172 }
  0xde   :  { %v192_v19 = vadd.f32 1.0, %v1173_v18 }
  0xe0   :  { %1174 = vrcp.f32 %v192_v19 }
  0xed   :  { %v1175_v20 = vpop.eup %1174 }
  0xee   :  { %v196_v23 = vmul.f32 0.0, %v1175_v20 }
 0x14e   :  { %v199_v21 = vpop.permute.xlu0 %198 }
 0x14f   :  { %v201_v22 = vmul.f32 %v1175_v20, %v199_v21 }
 0x151   :  { %203 = vrot.lane.b32.xlu0 %v201_v22, %s1259_s3 }
 0x1c3   :  { %v204_v24 = vpop.permute.xlu0 %203 }
 0x1c4   :  { %v206_v25 = vadd.f32 %v204_v24, %v196_v23 }
 0x1c6   :  { %1176 = vtanh.f32 %v206_v25  ;;  %v300_v41 = vrot.slane %v206_v25, 6 }
 0x1d3   :  { %v1177_v26 = vpop.eup %1176 }
 0x1d4   :  { %209 = vrot.lane.b32.xlu1 %v1177_v26, %s1258_s28 }
 0x246   :  { %v210_v27 = vpop.permute.xlu1 %209 }
 0x247   :  { %v212_v28 = vmul.f32 %v1175_v20, %v210_v27 }
 0x249   :  { %214 = vrot.lane.b32.xlu1 %v212_v28, %s1259_s3 }
 0x2bb   :  { %v1361_v29 = vpop.permute.xlu1 %214 }
 0x2bc   :  { %1096 = vmatmul.mubr.msk.f32.vlgmr.msra.gmra.mxu0 %vm114_vm2, %v1361_v29 }
 0x2bd   :  { %1110 = vmatpush3.msra.mxu0 %v1296_v2  ;;  %1117 = vmatprep.mubr.msk.f32.mxu0 %vm1257_vm1, %v1256_v3 }
 0x2be   :  { %1111 = vmatprep.subr.mxu0 %v1256_v3 }
 0x2bf   :  { %1112 = vmatpush3.msra.mxu0 %v1305_v5 }
 0x2c0   :  { %1113 = vmatprep.subr.mxu0 %v1256_v3 }
 0x2c1   :  { %1114 = vmatpush3.msra.mxu0 %v1312_v6 }
 0x2c2   :  { %1115 = vmatprep.subr.mxu0 %v1256_v3 }
 0x2c3   :  { %1116 = vmatpush3.msra.mxu0 %v1322_v7 }
 0x2c4   :  { %1131 = vmatprep.subr.mxu0 %v1256_v3 }
 0x37c   :  { %v284_v30 = vpop.f32.mrf.mxu0 }
 0x37d   :  { %v289_v31 = vrot.slane %v284_v30, 6 }
 0x37e   :  { %v1097_v32 = vpop.f32.mrf.mxu0 }
 0x37f   :  { %v291_v33 = vadd.f32 %v289_v31, %v1354_v12 }
 0x381   :  { %1178 = vtanh.f32 %v291_v33  ;;  %v1014_v35 = vmul.f32 -1.442695, %v291_v33 }
 0x383   :  { %1180 = vpow2.f32 %v1014_v35 }
 0x38e   :  { %v1179_v34 = vpop.eup %1178 }
 0x38f   :  { %304 = vrot.lane.b32.xlu0 %v1179_v34, %s1258_s28 }
 0x390   :  { %v1181_v36 = vpop.eup %1180 }
 0x391   :  { %v295_v37 = vadd.f32 1.0, %v1181_v36 }
 0x393   :  { %1182 = vrcp.f32 %v295_v37 }
 0x3a0   :  { %v1183_v38 = vpop.eup %1182 }
 0x3a1   :  { %v302_v42 = vmul.f32 %v1183_v38, %v300_v41 }
 0x401   :  { %v305_v39 = vpop.permute.xlu0 %304 }
 0x402   :  { %v307_v40 = vmul.f32 %v1183_v38, %v305_v39 }
 0x404   :  { %309 = vrot.lane.b32.xlu1 %v307_v40, %s1259_s3 }
 0x476   :  { %v310_v43 = vpop.permute.xlu1 %309 }
 0x477   :  { %v312_v44 = vadd.f32 %v310_v43, %v302_v42 }
 0x479   :  { %1184 = vtanh.f32 %v312_v44  ;;  %v407_v61 = vrot.slane %v312_v44, 6 }
 0x486   :  { %v1185_v45 = vpop.eup %1184 }
 0x487   :  { %315 = vrot.lane.b32.xlu0 %v1185_v45, %s1258_s28 }
 0x4f9   :  { %v316_v46 = vpop.permute.xlu0 %315 }
 0x4fa   :  { %v1379_v47 = vmul.f32 %v1183_v38, %v316_v46 }
 0x4fc   :  { %v320_v48 = vrot.slane %v1379_v47, 2 }
 0x4fe   :  { %321 = vrot.lane.b32.xlu1 %v320_v48, %s1259_s3 }
 0x570   :  { %v322_v49 = vpop.permute.xlu1 %321 }
 0x571   :  { %1107 = vmatmul.mubr.msk.f32.vlgmr.msra.gmra.mxu1 %vm114_vm2, %v322_v49 }
 0x572   :  { %1121 = vmatpush3.msra.mxu1 %v1296_v2  ;;  %1128 = vmatprep.mubr.msk.f32.mxu1 %vm1257_vm1, %v1256_v3 }
 0x573   :  { %1122 = vmatprep.subr.mxu1 %v1256_v3 }
 0x574   :  { %1123 = vmatpush3.msra.mxu1 %v1305_v5 }
 0x575   :  { %1124 = vmatprep.subr.mxu1 %v1256_v3 }
 0x576   :  { %1125 = vmatpush3.msra.mxu1 %v1312_v6 }
 0x577   :  { %1126 = vmatprep.subr.mxu1 %v1256_v3 }
 0x578   :  { %1127 = vmatpush3.msra.mxu1 %v1322_v7 }
 0x579   :  { %1142 = vmatprep.subr.mxu1 %v1256_v3 }
 0x631   :  { %v391_v50 = vpop.f32.mrf.mxu1 }
 0x632   :  { %v396_v51 = vrot.slane %v391_v50, 4 }
 0x633   :  { %v1108_v52 = vpop.f32.mrf.mxu1 }
 0x634   :  { %v398_v53 = vadd.f32 %v396_v51, %v1354_v12 }
 0x636   :  { %1186 = vtanh.f32 %v398_v53  ;;  %v1016_v55 = vmul.f32 -1.442695, %v398_v53 }
 0x638   :  { %1188 = vpow2.f32 %v1016_v55 }
 0x643   :  { %v1187_v54 = vpop.eup %1186 }
 0x644   :  { %411 = vrot.lane.b32.xlu0 %v1187_v54, %s1258_s28 }
 0x645   :  { %v1189_v56 = vpop.eup %1188 }
 0x646   :  { %v402_v57 = vadd.f32 1.0, %v1189_v56 }
 0x648   :  { %1190 = vrcp.f32 %v402_v57 }
 0x655   :  { %v1191_v58 = vpop.eup %1190 }
 0x656   :  { %v409_v62 = vmul.f32 %v1191_v58, %v407_v61 }
 0x6b6   :  { %v412_v59 = vpop.permute.xlu0 %411 }
 0x6b7   :  { %v414_v60 = vmul.f32 %v1191_v58, %v412_v59 }
 0x6b9   :  { %416 = vrot.lane.b32.xlu1 %v414_v60, %s1259_s3 }
 0x72b   :  { %v417_v63 = vpop.permute.xlu1 %416 }
 0x72c   :  { %v419_v0 = vadd.f32 %v417_v63, %v409_v62 }
 0x72e   :  { %1192 = vtanh.f32 %v419_v0  ;;  %v514_v24 = vrot.slane %v419_v0, 6 }
 0x73b   :  { %v1193_v1 = vpop.eup %1192 }
 0x73c   :  { %422 = vrot.lane.b32.xlu0 %v1193_v1, %s1258_s28 }
 0x7ae   :  { %v423_v4 = vpop.permute.xlu0 %422 }
 0x7af   :  { %v1400_v8 = vmul.f32 %v1191_v58, %v423_v4 }
 0x7b1   :  { %v427_v9 = vrot.slane %v1400_v8, 4 }
 0x7b3   :  { %428 = vrot.lane.b32.xlu1 %v427_v9, %s1259_s3 }
 0x825   :  { %v429_v11 = vpop.permute.xlu1 %428 }
 0x826   :  { %1118 = vmatmul.mubr.msk.f32.vlgmr.msra.gmra.mxu0 %vm114_vm2, %v429_v11 }
 0x827   :  { %1132 = vmatpush3.msra.mxu0 %v1296_v2  ;;  %1139 = vmatprep.mubr.msk.f32.mxu0 %vm1257_vm1, %v1256_v3 }
 0x828   :  { %1133 = vmatprep.subr.mxu0 %v1256_v3 }
 0x829   :  { %1134 = vmatpush3.msra.mxu0 %v1305_v5 }
 0x82a   :  { %1135 = vmatprep.subr.mxu0 %v1256_v3 }
 0x82b   :  { %1136 = vmatpush3.msra.mxu0 %v1312_v6 }
 0x82c   :  { %1137 = vmatprep.subr.mxu0 %v1256_v3 }
 0x82d   :  { %1138 = vmatpush3.msra.mxu0 %v1322_v7 }
 0x82e   :  { %1153 = vmatprep.subr.mxu0 %v1256_v3 }
 0x8e6   :  { %v498_v13 = vpop.f32.mrf.mxu0 }
 0x8e7   :  { %v503_v14 = vrot.slane %v498_v13, 2 }
 0x8e8   :  { %v1119_v15 = vpop.f32.mrf.mxu0 }
 0x8e9   :  { %v505_v16 = vadd.f32 %v503_v14, %v1354_v12 }
 0x8eb   :  { %1194 = vtanh.f32 %v505_v16  ;;  %v1018_v18 = vmul.f32 -1.442695, %v505_v16 }
 0x8ed   :  { %1196 = vpow2.f32 %v1018_v18 }
 0x8f8   :  { %v1195_v17 = vpop.eup %1194 }
 0x8f9   :  { %518 = vrot.lane.b32.xlu0 %v1195_v17, %s1258_s28 }
 0x8fa   :  { %v1197_v19 = vpop.eup %1196 }
 0x8fb   :  { %v509_v20 = vadd.f32 1.0, %v1197_v19 }
 0x8fd   :  { %1198 = vrcp.f32 %v509_v20 }
 0x90a   :  { %v1199_v21 = vpop.eup %1198 }
 0x90b   :  { %v516_v25 = vmul.f32 %v1199_v21, %v514_v24 }
 0x96b   :  { %v519_v22 = vpop.permute.xlu0 %518 }
 0x96c   :  { %v521_v23 = vmul.f32 %v1199_v21, %v519_v22 }
 0x96e   :  { %523 = vrot.lane.b32.xlu1 %v521_v23, %s1259_s3 }
 0x9e0   :  { %v524_v26 = vpop.permute.xlu1 %523 }
 0x9e1   :  { %v526_v27 = vadd.f32 %v524_v26, %v516_v25 }
 0x9e3   :  { %1200 = vtanh.f32 %v526_v27  ;;  %v618_v43 = vrot.slane %v526_v27, 6 }
 0x9f0   :  { %v1201_v12 = vpop.eup %1200 }
 0x9f1   :  { %529 = vrot.lane.b32.xlu0 %v1201_v12, %s1258_s28 }
 0xa63   :  { %v530_v28 = vpop.permute.xlu0 %529 }
 0xa64   :  { %v1421_v30 = vmul.f32 %v1199_v21, %v530_v28 }
 0xa66   :  { %v534_v31 = vrot.slane %v1421_v30, 6 }
 0xa68   :  { %535 = vrot.lane.b32.xlu1 %v534_v31, %s1259_s3 }
 0xada   :  { %v536_v32 = vpop.permute.xlu1 %535 }
 0xadb   :  { %1129 = vmatmul.mubr.msk.f32.vlgmr.msra.gmra.mxu1 %vm114_vm2, %v536_v32 }
 0xadc   :  { %1143 = vmatpush3.msra.mxu1 %v1296_v2  ;;  %1150 = vmatprep.mubr.msk.f32.mxu1 %vm1257_vm1, %v1256_v3 }
 0xadd   :  { %1144 = vmatprep.subr.mxu1 %v1256_v3 }
 0xade   :  { %1145 = vmatpush3.msra.mxu1 %v1305_v5 }
 0xadf   :  { %1146 = vmatprep.subr.mxu1 %v1256_v3 }
 0xae0   :  { %1147 = vmatpush3.msra.mxu1 %v1312_v6 }
 0xae1   :  { %1148 = vmatprep.subr.mxu1 %v1256_v3 }
 0xae2   :  { %1149 = vmatpush3.msra.mxu1 %v1322_v7 }
 0xb9b   :  { %v605_v33 = vpop.f32.mrf.mxu1 }
 0xb9c   :  { %v609_v34 = vadd.f32 %v605_v33, %v1352_v10 }
 0xb9d   :  { %v1130_v35 = vpop.f32.mrf.mxu1 }
 0xb9e   :  { %1202 = vtanh.f32 %v609_v34  ;;  %v1020_v37 = vmul.f32 -1.442695, %v609_v34 }
 0xba0   :  { %1204 = vpow2.f32 %v1020_v37 }
 0xbab   :  { %v1203_v36 = vpop.eup %1202 }
 0xbac   :  { %622 = vrot.lane.b32.xlu0 %v1203_v36, %s1258_s28 }
 0xbad   :  { %v1205_v38 = vpop.eup %1204 }
 0xbae   :  { %v613_v39 = vadd.f32 1.0, %v1205_v38 }
 0xbb0   :  { %1206 = vrcp.f32 %v613_v39 }
 0xbbd   :  { %v1207_v40 = vpop.eup %1206 }
 0xbbe   :  { %v620_v44 = vmul.f32 %v1207_v40, %v618_v43 }
 0xc1e   :  { %v623_v41 = vpop.permute.xlu0 %622 }
 0xc1f   :  { %v625_v42 = vmul.f32 %v1207_v40, %v623_v41 }
 0xc21   :  { %627 = vrot.lane.b32.xlu1 %v625_v42, %s1259_s3 }
 0xc93   :  { %v628_v45 = vpop.permute.xlu1 %627 }
 0xc94   :  { %v630_v46 = vadd.f32 %v628_v45, %v620_v44 }
 0xc96   :  { %1208 = vtanh.f32 %v630_v46 }
 0xca3   :  { %v1209_v49 = vpop.eup %1208 }
 0xca4   :  { %633 = vrot.lane.b32.xlu0 %v1209_v49, %s1258_s28 }
 0xd16   :  { %v634_v50 = vpop.permute.xlu0 %633 }
 0xd17   :  { %v636_v51 = vmul.f32 %v1207_v40, %v634_v50 }
 0xd19   :  { %638 = vrot.lane.b32.xlu1 %v636_v51, %s1259_s3 }
 0xd8b   :  { %v1442_v52 = vpop.permute.xlu1 %638 }
 0xd8c   :  { %1140 = vmatmul.mubr.msk.f32.vlgmr.msra.gmra.mxu0 %vm114_vm2, %v1442_v52 }
 0xd8d   :  { %1154 = vmatpush3.msra.mxu0 %v1296_v2  ;;  %1161 = vmatprep.mubr.msk.f32.mxu0 %vm1257_vm1, %v1256_v3 }
 0xd8e   :  { %1155 = vmatprep.subr.mxu0 %v1256_v3 }
 0xd8f   :  { %1156 = vmatpush3.msra.mxu0 %v1305_v5 }
 0xd90   :  { %1157 = vmatprep.subr.mxu0 %v1256_v3 }
 0xd91   :  { %1158 = vmatpush3.msra.mxu0 %v1312_v6 }
 0xd92   :  { %1159 = vmatprep.subr.mxu0 %v1256_v3  ;;  %v724_v3 = vrot.slane %v630_v46, 6 }
 0xd93   :  { %1160 = vmatpush3.msra.mxu0 %v1322_v7 }
 0xe4c   :  { %v708_v53 = vpop.f32.mrf.mxu0 }
 0xe4d   :  { %v713_v54 = vrot.slane %v708_v53, 6 }
 0xe4e   :  { %v1141_v55 = vpop.f32.mrf.mxu0 }
 0xe4f   :  { %v715_v2 = vadd.f32 %v713_v54, %v1352_v10 }
 0xe51   :  { %1210 = vtanh.f32 %v715_v2  ;;  %v1022_v57 = vmul.f32 -1.442695, %v715_v2 }
 0xe53   :  { %1212 = vpow2.f32 %v1022_v57 }
 0xe5e   :  { %v1211_v56 = vpop.eup %1210 }
 0xe5f   :  { %728 = vrot.lane.b32.xlu0 %v1211_v56, %s1258_s28 }
 0xe60   :  { %v1213_v5 = vpop.eup %1212 }
 0xe61   :  { %v719_v58 = vadd.f32 1.0, %v1213_v5 }
 0xe63   :  { %1214 = vrcp.f32 %v719_v58 }
 0xe70   :  { %v1215_v59 = vpop.eup %1214 }
 0xe71   :  { %v726_v7 = vmul.f32 %v1215_v59, %v724_v3 }
 0xed1   :  { %v729_v6 = vpop.permute.xlu0 %728 }
 0xed2   :  { %v731_v60 = vmul.f32 %v1215_v59, %v729_v6 }
 0xed4   :  { %733 = vrot.lane.b32.xlu1 %v731_v60, %s1259_s3 }
 0xf46   :  { %v734_v61 = vpop.permute.xlu1 %733 }
 0xf47   :  { %v736_v62 = vadd.f32 %v734_v61, %v726_v7 }
 0xf49   :  { %1216 = vtanh.f32 %v736_v62  ;;  %v831_v24 = vrot.slane %v736_v62, 6 }
 0xf56   :  { %v1217_v63 = vpop.eup %1216 }
 0xf57   :  { %739 = vrot.lane.b32.xlu0 %v1217_v63, %s1258_s28 }
 0xfc9   :  { %v740_v0 = vpop.permute.xlu0 %739 }
 0xfca   :  { %v742_v1 = vmul.f32 %v1215_v59, %v740_v0 }
 0xfcc   :  { %v744_v4 = vrot.slane %v742_v1, 2 }
 0xfce   :  { %745 = vrot.lane.b32.xlu1 %v744_v4, %s1259_s3 }
0x1040   :  { %v746_v11 = vpop.permute.xlu1 %745 }
0x1041   :  { %1151 = vmatmul.mubr.msk.f32.vlgmr.msra.gmra.mxu1 %vm114_vm2, %v746_v11 }
0x1101   :  { %v815_v13 = vpop.f32.mrf.mxu1 }
0x1102   :  { %v820_v14 = vrot.slane %v815_v13, 4 }
0x1103   :  { %v1152_v15 = vpop.f32.mrf.mxu1 }
0x1104   :  { %v822_v16 = vadd.f32 %v820_v14, %v1352_v10 }
0x1106   :  { %1218 = vtanh.f32 %v822_v16  ;;  %v1024_v18 = vmul.f32 -1.442695, %v822_v16 }
0x1108   :  { %1220 = vpow2.f32 %v1024_v18 }
0x1113   :  { %v1219_v17 = vpop.eup %1218 }
0x1114   :  { %835 = vrot.lane.b32.xlu0 %v1219_v17, %s1258_s28 }
0x1115   :  { %v1221_v19 = vpop.eup %1220 }
0x1116   :  { %v826_v20 = vadd.f32 1.0, %v1221_v19 }
0x1118   :  { %1222 = vrcp.f32 %v826_v20 }
0x1125   :  { %v1223_v21 = vpop.eup %1222 }
0x1126   :  { %v833_v25 = vmul.f32 %v1223_v21, %v831_v24 }
0x1186   :  { %v836_v22 = vpop.permute.xlu0 %835 }
0x1187   :  { %v838_v23 = vmul.f32 %v1223_v21, %v836_v22 }
0x1189   :  { %840 = vrot.lane.b32.xlu1 %v838_v23, %s1259_s3 }
0x11fb   :  { %v841_v26 = vpop.permute.xlu1 %840 }
0x11fc   :  { %v843_v27 = vadd.f32 %v841_v26, %v833_v25 }
0x11fe   :  { %1224 = vtanh.f32 %v843_v27 }
0x120b   :  { %v1225_v12 = vpop.eup %1224 }
0x120c   :  { %846 = vrot.lane.b32.xlu0 %v1225_v12, %s1258_s28 }
0x127e   :  { %v847_v28 = vpop.permute.xlu0 %846 }
0x127f   :  { %v849_v32 = vmul.f32 %v1223_v21, %v847_v28 }
0x1281   :  { %v851_v33 = vrot.slane %v849_v32, 4 }
0x1283   :  { %852 = vrot.lane.b32.xlu1 %v851_v33, %s1259_s3 }
0x12f5   :  { %v853_v34 = vpop.permute.xlu1 %852 }
0x12f6   :  { %1162 = vmatmul.mubr.msk.f32.vlgmr.msra.gmra.mxu0 %vm114_vm2, %v853_v34 }
0x13b6   :  { %v922_v35 = vpop.f32.mrf.mxu0 }
0x13b7   :  { %v927_v36 = vrot.slane %v922_v35, 2 }
0x13b8   :  { %v1163_v37 = vpop.f32.mrf.mxu0 }
0x13b9   :  { %v929_v38 = vadd.f32 %v927_v36, %v1352_v10  ;;  %v938_v10 = vrot.slane %v843_v27, 6 }
0x13bb   :  { %1226 = vtanh.f32 %v929_v38  ;;  %v1026_v40 = vmul.f32 -1.442695, %v929_v38 }
0x13bd   :  { %1228 = vpow2.f32 %v1026_v40 }
0x13c8   :  { %v1227_v39 = vpop.eup %1226 }
0x13c9   :  { %942 = vrot.lane.b32.xlu0 %v1227_v39, %s1258_s28 }
0x13ca   :  { %v1229_v41 = vpop.eup %1228 }
0x13cb   :  { %v933_v42 = vadd.f32 1.0, %v1229_v41 }
0x13cd   :  { %966 = vrot.lane.b32.xlu0 %v744_v4, %s1258_s28  ;;  %1230 = vrcp.f32 %v933_v42 }
0x13da   :  { %v1231_v43 = vpop.eup %1230 }
0x13db   :  { %v940_v46 = vmul.f32 %v1231_v43, %v938_v10 }
0x143b   :  { %v943_v44 = vpop.permute.xlu0 %942 }
0x143c   :  { %v945_v45 = vmul.f32 %v1231_v43, %v943_v44 }
0x143e   :  { %947 = vrot.lane.b32.xlu1 %v945_v45, %s1259_s3 }
0x143f   :  { %v967_v54 = vpop.permute.xlu0 %966 }
0x1440   :  { %v980_v56 = vsel %vm114_vm2, %v1442_v52, %v967_v54 }
0x1442   :  { %958 = vrot.lane.b32.xlu1 %v320_v48, %s1258_s28 }
0x1446   :  { %961 = vrot.lane.b32.xlu1 %v427_v9, %s1260_s29 }
0x14b0   :  { %v948_v49 = vpop.permute.xlu1 %947 }
0x14b1   :  { %v950_v50 = vadd.f32 %v948_v49, %v940_v46 }
0x14b3   :  { %1232 = vtanh.f32 %v950_v50 }
0x14b4   :  { %v959_v53 = vpop.permute.xlu1 %958 }
0x14b5   :  { %v975_v48 = vsel %vm114_vm2, %v1361_v29, %v959_v53 }
0x14b8   :  { %v962_v55 = vpop.permute.xlu1 %961 }
0x14b9   :  { %v977_v8 = vsel %vm976_vm3, %v975_v48, %v962_v55 }
0x14ba   :  { %v979_v58 = vsel %vm978_vm4, %v977_v8, %v534_v31 }
0x14c0   :  { %v1233_v51 = vpop.eup %1232 }
0x14c1   :  { %953 = vrot.lane.b32.xlu0 %v1233_v51, %s1258_s28 }
0x14c5   :  { %969 = vrot.lane.b32.xlu0 %v851_v33, %s1260_s29 }
0x1533   :  { %v954_v2 = vpop.permute.xlu0 %953 }
0x1534   :  { %v956_v47 = vmul.f32 %v1231_v43, %v954_v2 }
0x1536   :  { %v973_v9 = vrot.slane %v956_v47, 6 }
0x1537   :  { %v970_v57 = vpop.permute.xlu0 %969 }
0x1538   :  { %v981_v5 = vsel %vm976_vm3, %v980_v56, %v970_v57 }
0x1539   :  { %v982_v59 = vsel %vm978_vm4, %v981_v5, %v973_v9 }
0x153a   :  { %v985_v6 = vcombine.low %v979_v58, %v982_v59 }
0x153c   :  { %1027 = vst.sshfl [vmem:[#allocation2] sm:$0x33 pattern:$0x76325410] %v985_v6 }
0x153d   :  { %1245 = shalt.err (!%p1242_p4)
}
0x153e   :  { %1004 = dma.vmem_to_hbm [thread:$0]  %s1002_s5, 64, %s1490_s4, [#allocation3]  }
0x153f   :  { %1254 = dma.done.wait [#allocation3], 64  }
0x1540   :  { %1255 = vsyncadd [#allocation3], 4294967232 }
0x1541   :  { %1008 = vsyncpa [#allocation3], 1 }

</bundles_post_ra>
